<compile_context>
chip_gen: v6e
topology: v6e:2x2x1
jax: 0.10.0
libtpu: 0.0.40
codegen_flags: <defaults>
</compile_context>

<pallas_src>
import functools

import jax
import jax.numpy as jnp
from jax import lax
from jax.experimental import pallas as pl
from jax.experimental.pallas import tpu as pltpu

# ---- module config (from the PyTorch script) ----
d_model = 9
img_size = (32, 32)
n_channels = 1
patch_size = (16, 16)

COMPUTE_DTYPE = jnp.bfloat16  # streamed-operand dtype; accumulation is f32


def _round_up(x, m):
    return ((x + m - 1) // m) * m


def _patch_embed_kernel(p_ref, w_ref, b_ref, o_ref):
    # p_ref: (TM, K)  bf16   -- patch rows
    # w_ref: (Np, K)  bf16   -- conv weight, rows zero-padded N -> Np (lane dense)
    # b_ref: (1, Np)  f32    -- bias, zero-padded
    # o_ref: (TM, Np) f32
    acc = lax.dot_general(
        p_ref[...], w_ref[...],
        dimension_numbers=(((1,), (1,)), ((), ())),   # contract K with K: A @ W^T
        preferred_element_type=jnp.float32)           # f32 accumulate on the MXU
    o_ref[...] = acc + b_ref[...]                     # f32 epilogue (v5e-safe)


@jax.jit
def patch_embedding(x, weight, bias):
    """Equivalent of PatchEmbedding.forward.

    x      : (B, C, H, W) float32
    weight : (d_model, C, ph, pw)   Conv2d weight (kernel == stride == patch)
    bias   : (d_model,)
    returns: (B, num_patches, d_model) float32
    """
    B, C, H, W = x.shape
    ph, pw = patch_size
    gh, gw = H // ph, W // pw
    num_patches = gh * gw
    K = C * ph * pw
    N = weight.shape[0]
    M = B * num_patches

    # Lane-dense output width (multiple of 128); sliced back after the call.
    Np = _round_up(N, 128)

    # M tile: big enough to amortize per-step overhead, small enough for VMEM
    # (512 rows x K fits comfortably even under v7x's 64 MiB with K up to a
    # few thousand).  The M axis is "parallel" -> megacore sharding on v7x.
    TM = min(512, _round_up(M, 8))
    M_pad = _round_up(M, TM)

    # --- patch extraction: one fused XLA transpose + bf16 downcast ----------
    # (B,C,gh,ph,gw,pw) -> (B,gh,gw,C,ph,pw) -> (M,K); row order p = i*gw + j
    # matches the Conv2d output flatten order.  Casting here halves the HBM
    # bytes the kernel streams.
    # TODO(synk): at production sizes the extraction could be folded into the
    # BlockSpec DMA (grid over patches) instead of this XLA copy.
    patches = x.reshape(B, C, gh, ph, gw, pw)
    patches = patches.transpose(0, 2, 4, 1, 3, 5).reshape(M, K)
    patches = patches.astype(COMPUTE_DTYPE)
    if M_pad != M:
        patches = jnp.pad(patches, ((0, M_pad - M), (0, 0)))

    # Conv weight (N, C, ph, pw) -> (N, K); zero-pad rows to Np.  No HBM
    # transpose: the MXU handles the transposed contraction natively.
    w2 = weight.reshape(N, K).astype(COMPUTE_DTYPE)
    w2 = jnp.pad(w2, ((0, Np - N), (0, 0)))
    b2 = jnp.pad(bias.astype(jnp.float32), (0, Np - N)).reshape(1, Np)

    out = pl.pallas_call(
        _patch_embed_kernel,
        out_shape=jax.ShapeDtypeStruct((M_pad, Np), jnp.float32),
        grid=(M_pad // TM,),
        in_specs=[
            pl.BlockSpec((TM, K), lambda i: (i, 0)),
            pl.BlockSpec((Np, K), lambda i: (0, 0)),
            pl.BlockSpec((1, Np), lambda i: (0, 0)),
        ],
        out_specs=pl.BlockSpec((TM, Np), lambda i: (i, 0)),
        compiler_params=pltpu.CompilerParams(
            dimension_semantics=("parallel",)),
    )(patches, w2, b2)

    # Slice away the M / N padding (padded bias columns are zero, padded rows
    # are discarded) and restore the (B, num_patches, d_model) layout.
    return out[:M, :N].reshape(B, num_patches, N)


if __name__ == "__main__":
    key = jax.random.PRNGKey(0)
    kx, kw, kb = jax.random.split(key, 3)

    B = 2
    x = jax.random.normal(
        kx, (B, n_channels, img_size[0], img_size[1]), dtype=jnp.float32)
    # Conv2d parameter shapes: weight (d_model, C, ph, pw), bias (d_model,)
    weight = jax.random.normal(
        kw, (d_model, n_channels, patch_size[0], patch_size[1]),
        dtype=jnp.float32) * 0.02
    bias = jax.random.normal(kb, (d_model,), dtype=jnp.float32) * 0.02

    out = jax.block_until_ready(patch_embedding(x, weight, bias))

    gh, gw = img_size[0] // patch_size[0], img_size[1] // patch_size[1]
    assert out.shape == (B, gh * gw, d_model)

    # pure-JAX f32 reference (strided conv via patch extraction)
    pref = x.reshape(B, n_channels, gh, patch_size[0], gw, patch_size[1])
    pref = pref.transpose(0, 2, 4, 1, 3, 5).reshape(B, gh * gw, -1)
    ref = pref @ weight.reshape(d_model, -1).T + bias[None, None, :]

    # Kernel streams bf16 operands with f32 accumulation -> modest tolerance.
    err = float(jnp.max(jnp.abs(out - ref)))
    assert jnp.allclose(out, ref, atol=3e-2, rtol=3e-2), err

    print("KERNEL_OK")
</pallas_src>

<mosaic_0001>
module attributes {stable_mosaic.version = 11 : i64} {
  func.func @_patch_embed_kernel(%arg0: i32, %arg1: memref<8x256xbf16, #tpu.memory_space<vmem>>, %arg2: memref<128x256xbf16, #tpu.memory_space<vmem>>, %arg3: memref<1x128xf32, #tpu.memory_space<vmem>>, %arg4: memref<8x128xf32, #tpu.memory_space<vmem>>) attributes {dimension_semantics = [#tpu.dimension_semantics<parallel>], iteration_bounds = array<i64: 1>, scalar_prefetch = 0 : i64, scratch_operands = 0 : i64, tpu.core_type = #tpu.core_type<tc>, window_params = [{transform_indices = @transform_0, window_bounds = array<i64: 8, 256>}, {pipeline_mode = #tpu.pipeline_mode<synchronous>, transform_indices = @transform_1, window_bounds = array<i64: 128, 256>}, {pipeline_mode = #tpu.pipeline_mode<synchronous>, transform_indices = @transform_2, window_bounds = array<i64: 1, 128>}, {transform_indices = @transform_3, window_bounds = array<i64: 8, 128>}]} {
    %c0 = arith.constant 0 : index
    %c0_0 = arith.constant 0 : index
    %0 = vector.load %arg1[%c0, %c0_0] : memref<8x256xbf16, #tpu.memory_space<vmem>>, vector<8x256xbf16>
    %c0_1 = arith.constant 0 : index
    %c0_2 = arith.constant 0 : index
    %1 = vector.load %arg2[%c0_1, %c0_2] : memref<128x256xbf16, #tpu.memory_space<vmem>>, vector<128x256xbf16>
    %cst = arith.constant dense<0.000000e+00> : vector<8x128xf32>
    %2 = tpu.matmul %0, %1, %cst {dimension_numbers = #tpu.dot_dimension_numbers<[1], [1], [0], [0], [0, 0, 1, 0], [], []>} : vector<8x256xbf16>, vector<128x256xbf16>, vector<8x128xf32> -> vector<8x128xf32>
    %c0_3 = arith.constant 0 : index
    %c0_4 = arith.constant 0 : index
    %3 = vector.load %arg3[%c0_3, %c0_4] : memref<1x128xf32, #tpu.memory_space<vmem>>, vector<1x128xf32>
    %4 = vector.broadcast %3 : vector<1x128xf32> to vector<8x128xf32>
    %5 = arith.addf %2, %4 : vector<8x128xf32>
    %c0_5 = arith.constant 0 : index
    %c0_6 = arith.constant 0 : index
    %6 = vector.load %arg4[%c0_5, %c0_6] : memref<8x128xf32, #tpu.memory_space<vmem>>, vector<8x128xf32>
    tpu.vector_store %arg4[%c0_5, %c0_6], %5 {strides = array<i32>} : memref<8x128xf32, #tpu.memory_space<vmem>>, vector<8x128xf32>,
    return
  }
  func.func @transform_0(%arg0: i32) -> (i32, i32) {
    %c0_i32 = arith.constant 0 : i32
    %c0_i32_0 = arith.constant 0 : i32
    return %arg0, %c0_i32 : i32, i32
  }
  func.func @transform_1(%arg0: i32) -> (i32, i32) {
    %c0_i32 = arith.constant 0 : i32
    %c0_i32_0 = arith.constant 0 : i32
    %c0_i32_1 = arith.constant 0 : i32
    return %c0_i32, %c0_i32_0 : i32, i32
  }
  func.func @transform_2(%arg0: i32) -> (i32, i32) {
    %c0_i32 = arith.constant 0 : i32
    %c0_i32_0 = arith.constant 0 : i32
    %c0_i32_1 = arith.constant 0 : i32
    return %c0_i32, %c0_i32_0 : i32, i32
  }
  func.func @transform_3(%arg0: i32) -> (i32, i32) {
    %c0_i32 = arith.constant 0 : i32
    %c0_i32_0 = arith.constant 0 : i32
    return %arg0, %c0_i32 : i32, i32
  }
}

</mosaic_0001>

<bundles_post_ra>
// kernel: patch_embedding.1
= control target key start
LH: loop header
LB: loop body
LE: loop exit
PB: predicated region body
PF: predicated region fallthrough
CT: control target
= control target key end

     0   :  { %s328_s0 = inlined_call_operand.vmem [shape: bf16[8,256], index: 0, kind: input, shape index: {}]   ;;  %s329_s1 = inlined_call_operand.vmem [shape: bf16[128,256], index: 1, kind: input, shape index: {}]   ;;  %s330_s2 = inlined_call_operand.vmem [shape: f32[1,128], index: 2, kind: input, shape index: {}]   ;;  %s331_s3 = inlined_call_operand.hbm [shape: f32[8,128], index: 3, kind: output, shape index: {}]  }
   0x1   :  { %v202_v0 = vld [vmem:[%s329_s1 + $0x74] ss:$8 sps:$4 sm:$0xff]   ;;  %v204_v1 = vld [vmem:[%s329_s1 + $0x70] ss:$8 sps:$4 sm:$0xff]   ;;  %v205_v2 = vld [vmem:[%s329_s1 + $0x64] ss:$8 sps:$4 sm:$0xff]  }
   0x2   :  { %127 = vmatprep.subr.bf16.mxu0 %v202_v0  ;;  %v207_v3 = vld [vmem:[%s329_s1 + $0x60] ss:$8 sps:$4 sm:$0xff]   ;;  %v208_v4 = vld [vmem:[%s329_s1 + $0x54] ss:$8 sps:$4 sm:$0xff]  }
   0x3   :  { %128 = vmatpush1.bf16.xpose.msra.mxu0 %v204_v1  ;;  %v16_v5 = vld [vmem:[%s328_s0] sm:$0xff] }
   0x4   :  { %129 = vmatprep.subr.bf16.mxu0 %v205_v2  ;;  %v184_v6 = vcombine.high %v16_v5, %v16_v5 }
   0xb   :  { %130 = vmatpush1.bf16.xpose.msra.mxu0 %v207_v3 }
   0xc   :  { %8 = vsyncpa [#allocation3], 0  ;;  %131 = vmatprep.subr.bf16.mxu0 %v208_v4  ;;  %159 = vmatprep.mubr.bf16.mxu0 %v184_v6  ;;  %v210_v7 = vld [vmem:[%s329_s1 + $0x50] ss:$8 sps:$4 sm:$0xff]   ;;  %v211_v8 = vld [vmem:[%s329_s1 + $0x44] ss:$8 sps:$4 sm:$0xff]   ;;  %v183_v18 = vcombine.low %v16_v5, %v16_v5 }
   0xd   :  { %v213_v9 = vld [vmem:[%s329_s1 + $0x40] ss:$8 sps:$4 sm:$0xff]   ;;  %v214_v10 = vld [vmem:[%s329_s1 + $0x34] ss:$8 sps:$4 sm:$0xff]   ;;  %v216_v11 = vld [vmem:[%s329_s1 + $0x30] ss:$8 sps:$4 sm:$0xff]  }
   0xe   :  { %v217_v12 = vld [vmem:[%s329_s1 + $0x24] ss:$8 sps:$4 sm:$0xff]   ;;  %v219_v13 = vld [vmem:[%s329_s1 + $0x20] ss:$8 sps:$4 sm:$0xff]   ;;  %v220_v14 = vld [vmem:[%s329_s1 + $0x14] ss:$8 sps:$4 sm:$0xff]  }
   0xf   :  { %v222_v15 = vld [vmem:[%s329_s1 + $0x10] ss:$8 sps:$4 sm:$0xff]   ;;  %v223_v16 = vld [vmem:[%s329_s1 + $0x4] ss:$8 sps:$4 sm:$0xff]   ;;  %v225_v17 = vld [vmem:[%s329_s1] ss:$8 sps:$4 sm:$0xff]  }
  0x10   :  { %v182_v19 = vld [vmem:[%s330_s2] ss:$0 sm:$0xff]  ;;  %s250_s20 = smov [#allocation2]  }
  0x11   :  { %s174_s21 = sshll.u32 %s250_s20, 4  ;;  %s175_s21 = int_to_ptr.vmem [resolvable:$true] %s174_s21 }
  0x12   :  { %s228_s22 = scalar_lea.vmem %s175_s21, 128  ;;  %p233_p1 = scmp.lt.s32.totalorder %s175_s21, %s175_s21 }
  0x13   :  { %132 = vmatpush1.bf16.xpose.msra.mxu0 %v210_v7  ;;  %p229_p0 = scmp.ne.s32.totalorder %s175_s21, %s228_s22  ;;  %p234_p2 = scmp.lt.s32.totalorder %s228_s22, %s228_s22 }
  0x14   :  { %133 = vmatprep.subr.bf16.mxu0 %v211_v8 }
  0x15   :  { %p235_p3 = por %p234_p2, %p233_p1 }
  0x17   :  { %p236_p4 = pnand %p235_p3, %p229_p0 }
  0x1b   :  { %134 = vmatpush1.bf16.xpose.msra.mxu0 %v213_v9 }
  0x1c   :  { %135 = vmatprep.subr.bf16.mxu0 %v214_v10 }
  0x23   :  { %136 = vmatpush1.bf16.xpose.msra.mxu0 %v216_v11 }
  0x24   :  { %137 = vmatprep.subr.bf16.mxu0 %v217_v12 }
  0x2b   :  { %138 = vmatpush1.bf16.xpose.msra.mxu0 %v219_v13 }
  0x2c   :  { %139 = vmatprep.subr.bf16.mxu0 %v220_v14 }
  0x33   :  { %140 = vmatpush1.bf16.xpose.msra.mxu0 %v222_v15 }
  0x34   :  { %141 = vmatprep.subr.bf16.mxu0 %v223_v16 }
  0x3b   :  { %142 = vmatpush1.bf16.xpose.msra.mxu0 %v225_v17 }
  0x42   :  { %160 = vmatmul.mubr.bf16.vlgmr.msra.gmra.mxu0 %v183_v18 }
 0x102   :  { %v161_v20 = vpop.f32.mrf.mxu0 }
 0x103   :  { %v162_v21 = vadd.f32 %v182_v19, %v161_v20 }
 0x104   :  { %v163_v22 = vpop.f32.mrf.mxu0 }
 0x105   :  { %167 = vst [vmem:[#allocation2] sm:$0xff] %v162_v21 }
 0x106   :  { %v164_v23 = vpop.f32.mrf.mxu0 }
 0x107   :  { %239 = shalt.err (!%p236_p4)
}
 0x108   :  { %177 = dma.vmem_to_hbm [thread:$0]  %s175_s21, 128, %s331_s3, [#allocation3]   ;;  %v165_v24 = vpop.f32.mrf.mxu0 }
 0x109   :  { %248 = dma.done.wait [#allocation3], 128  }
 0x10a   :  { %249 = vsyncadd [#allocation3], 4294967168 }
 0x10b   :  { %181 = vsyncpa [#allocation3], 1 }

</bundles_post_ra>
